<compile_context>
chip_gen: v7x
topology: tpu7x:2x2x1
jax: 0.10.0
libtpu: 0.0.40
codegen_flags: <defaults>
</compile_context>

<pallas_src>
import jax
import jax.numpy as jnp
from jax.experimental import pallas as pl
from jax.experimental.pallas import tpu as pltpu


def _complex_attn_kernel(q_ref, k_ref, v_ref, out_ref, p_ref=None):
    """One grid step: TB (batch*head) pairs, full S x S attention in VMEM.

    q_ref/k_ref/v_ref/out_ref: (TB, S, 2D) fused [real | imag] float32 tiles.
    p_ref (optional):          (TB, S, S) float32 tile for the attention probs.
    """
    d2 = q_ref.shape[-1]
    d = d2 // 2                       # d_k = Q.size(-1) of the complex tensor
    inv_sqrt_dk = 1.0 / (float(d) ** 0.5)

    # Fold the 1/sqrt(d_k) scale into Q: |(s_r + i s_i)/sqrt(dk)| equals the
    # magnitude computed from scaled-Q scores.
    q = q_ref[...] * inv_sqrt_dk      # (TB, S, 2D), already scaled
    k = k_ref[...]
    v = v_ref[...]

    qr, qi = q[:, :, :d], q[:, :, d:]
    kr, ki = k[:, :, :d], k[:, :, d:]

    # scores_real = Qr Kr^T + Qi Ki^T  -> one contraction over the fused axis.
    sr = jnp.einsum('bqd,bkd->bqk', q, k, preferred_element_type=jnp.float32)
    # scores_imag = Qr Ki^T - Qi Kr^T
    si = (jnp.einsum('bqd,bkd->bqk', qr, ki, preferred_element_type=jnp.float32)
          - jnp.einsum('bqd,bkd->bqk', qi, kr, preferred_element_type=jnp.float32))

    # |scores| (scale already applied via q).
    mag = jnp.sqrt(sr * sr + si * si)

    # Numerically stable softmax over the last axis.  Exact reciprocal keeps
    # p_attn within 1e-5 of the f32 reference (approx=True would not).
    m = jnp.max(mag, axis=-1, keepdims=True)
    e = jnp.exp(mag - m)
    p = e * pl.reciprocal(jnp.sum(e, axis=-1, keepdims=True), approx=False)

    # [P @ Vr | P @ Vi] in a single contraction against the fused V.
    out = jnp.einsum('bqk,bkd->bqd', p, v, preferred_element_type=jnp.float32)

    out_ref[...] = out.astype(out_ref.dtype)
    if p_ref is not None:
        p_ref[...] = p.astype(p_ref.dtype)


def _choose_block_heads(bh, s, d, vmem_budget_bytes=8 * 1024 * 1024):
    """Pick how many (batch, head) pairs to process per grid step.

    Largest divisor of `bh` that fits the VMEM budget (double-buffered f32
    blocks: 3 inputs + fused output + p_attn), preferring >= 2 grid steps so
    the 'parallel' grid axis can be sharded across v7x's two TensorCores.
    """
    per_head = 2 * 4 * (4 * s * 2 * d + s * s)          # bytes, double-buffered
    cap = max(1, min(bh, vmem_budget_bytes // max(per_head, 1), 64))
    tb = cap
    while bh % tb:
        tb -= 1
    if tb == bh and bh > 1:                              # keep >= 2 grid steps
        tb = bh // 2
        while bh % tb:
            tb -= 1
    return tb


def complex_scaled_dot_product_attention(Q, K, V, return_p_attn=True):
    """Q, K, V: complex64 arrays of shape (B, H, S, D).

    Returns (output complex64 (B, H, S, D), p_attn float32 (B, H, S, S)).
    If return_p_attn=False, the attention matrix is neither computed to HBM
    nor returned (returns (output, None)) — saves the p_attn writeback traffic.
    """
    B, H, S, D = Q.shape
    BH = B * H
    TB = _choose_block_heads(BH, S, D)
    G = BH // TB

    def fuse(x):
        xf = x.reshape(BH, S, D)
        return jnp.concatenate(
            [jnp.real(xf).astype(jnp.float32), jnp.imag(xf).astype(jnp.float32)],
            axis=-1)                                     # (BH, S, 2D)

    q, k, v = fuse(Q), fuse(K), fuse(V)

    in_spec = pl.BlockSpec((TB, S, 2 * D), lambda i: (i, 0, 0))
    out_spec = pl.BlockSpec((TB, S, 2 * D), lambda i: (i, 0, 0))

    out_shapes = [jax.ShapeDtypeStruct((BH, S, 2 * D), jnp.float32)]
    out_specs = [out_spec]
    if return_p_attn:
        out_shapes.append(jax.ShapeDtypeStruct((BH, S, S), jnp.float32))
        out_specs.append(pl.BlockSpec((TB, S, S), lambda i: (i, 0, 0)))

    results = pl.pallas_call(
        _complex_attn_kernel,
        out_shape=tuple(out_shapes),
        grid_spec=pltpu.PrefetchScalarGridSpec(
            num_scalar_prefetch=0,
            grid=(G,),
            in_specs=[in_spec, in_spec, in_spec],
            out_specs=out_specs,
        ),
        compiler_params=pltpu.CompilerParams(
            dimension_semantics=("parallel",),
            vmem_limit_bytes=32 * 1024 * 1024),
    )(q, k, v)

    out_fused = results[0]                               # (BH, S, 2D)
    output = jax.lax.complex(out_fused[..., :D],
                             out_fused[..., D:]).reshape(B, H, S, D)
    if return_p_attn:
        p_attn = results[1].reshape(B, H, S, S)
        return output, p_attn
    return output, None


def _reference(Q, K, V):
    """Pure-JAX reference mirroring the PyTorch forward (eval mode)."""
    d_k = Q.shape[-1]
    Qr, Qi = jnp.real(Q), jnp.imag(Q)
    Kr, Ki = jnp.real(K), jnp.imag(K)
    sr = Qr @ jnp.swapaxes(Kr, -2, -1) + Qi @ jnp.swapaxes(Ki, -2, -1)
    si = Qr @ jnp.swapaxes(Ki, -2, -1) - Qi @ jnp.swapaxes(Kr, -2, -1)
    mag = jnp.abs(jax.lax.complex(sr, si) / (d_k ** 0.5))
    p = jax.nn.softmax(mag, axis=-1)
    out = jax.lax.complex(p @ jnp.real(V), p @ jnp.imag(V))
    return out, p


if __name__ == "__main__":
    B, H, S, D = 2, 2, 8, 32
    key = jax.random.PRNGKey(0)
    ks = jax.random.split(key, 6)

    def mk_complex(kr, ki):
        return jax.lax.complex(
            jax.random.normal(kr, (B, H, S, D), dtype=jnp.float32),
            jax.random.normal(ki, (B, H, S, D), dtype=jnp.float32))

    Q = mk_complex(ks[0], ks[1])
    K = mk_complex(ks[2], ks[3])
    V = mk_complex(ks[4], ks[5])

    out, p_attn = complex_scaled_dot_product_attention(Q, K, V)
    out = jax.block_until_ready(out)
    p_attn = jax.block_until_ready(p_attn)

    # sanity check against pure-JAX reference
    out_ref, p_ref = _reference(Q, K, V)
    assert out.shape == (B, H, S, D) and out.dtype == jnp.complex64
    assert p_attn.shape == (B, H, S, S)
    assert jnp.allclose(jnp.real(out), jnp.real(out_ref), atol=1e-4, rtol=1e-4)
    assert jnp.allclose(jnp.imag(out), jnp.imag(out_ref), atol=1e-4, rtol=1e-4)
    assert jnp.allclose(p_attn, p_ref, atol=1e-5, rtol=1e-5)

    # also exercise the p_attn-free fast path
    out2, _ = complex_scaled_dot_product_attention(Q, K, V, return_p_attn=False)
    out2 = jax.block_until_ready(out2)
    assert jnp.allclose(jnp.real(out2), jnp.real(out_ref), atol=1e-4, rtol=1e-4)
    assert jnp.allclose(jnp.imag(out2), jnp.imag(out_ref), atol=1e-4, rtol=1e-4)

    print("KERNEL_OK")
</pallas_src>

<mosaic_0001>
module attributes {stable_mosaic.version = 11 : i64} {
  func.func @_complex_attn_kernel(%arg0: i32, %arg1: memref<2x8x64xf32, #tpu.memory_space<vmem>>, %arg2: memref<2x8x64xf32, #tpu.memory_space<vmem>>, %arg3: memref<2x8x64xf32, #tpu.memory_space<vmem>>, %arg4: memref<2x8x64xf32, #tpu.memory_space<vmem>>, %arg5: memref<2x8x8xf32, #tpu.memory_space<vmem>>) attributes {dimension_semantics = [#tpu.dimension_semantics<parallel>], iteration_bounds = array<i64: 2>, scalar_prefetch = 0 : i64, scratch_operands = 0 : i64, tpu.core_type = #tpu.core_type<tc>, window_params = [{transform_indices = @transform_0, window_bounds = array<i64: 2, 8, 64>}, {transform_indices = @transform_1, window_bounds = array<i64: 2, 8, 64>}, {transform_indices = @transform_2, window_bounds = array<i64: 2, 8, 64>}, {transform_indices = @transform_3, window_bounds = array<i64: 2, 8, 64>}, {transform_indices = @transform_4, window_bounds = array<i64: 2, 8, 8>}]} {
    %c0 = arith.constant 0 : index
    %c0_0 = arith.constant 0 : index
    %c0_1 = arith.constant 0 : index
    %0 = vector.load %arg1[%c0, %c0_0, %c0_1] : memref<2x8x64xf32, #tpu.memory_space<vmem>>, vector<2x8x64xf32>
    %cst = arith.constant 0.176776692 : f32
    %1 = vector.broadcast %cst : f32 to vector<2x8x64xf32>
    %2 = arith.mulf %0, %1 : vector<2x8x64xf32>
    %c0_2 = arith.constant 0 : index
    %c0_3 = arith.constant 0 : index
    %c0_4 = arith.constant 0 : index
    %3 = vector.load %arg2[%c0_2, %c0_3, %c0_4] : memref<2x8x64xf32, #tpu.memory_space<vmem>>, vector<2x8x64xf32>
    %c0_5 = arith.constant 0 : index
    %c0_6 = arith.constant 0 : index
    %c0_7 = arith.constant 0 : index
    %4 = vector.load %arg3[%c0_5, %c0_6, %c0_7] : memref<2x8x64xf32, #tpu.memory_space<vmem>>, vector<2x8x64xf32>
    %5 = vector.extract_strided_slice %2 {offsets = [0, 0, 0], sizes = [2, 8, 32], strides = [1, 1, 1]} : vector<2x8x64xf32> to vector<2x8x32xf32>
    %6 = vector.extract_strided_slice %2 {offsets = [0, 0, 32], sizes = [2, 8, 32], strides = [1, 1, 1]} : vector<2x8x64xf32> to vector<2x8x32xf32>
    %7 = vector.extract_strided_slice %3 {offsets = [0, 0, 0], sizes = [2, 8, 32], strides = [1, 1, 1]} : vector<2x8x64xf32> to vector<2x8x32xf32>
    %8 = vector.extract_strided_slice %3 {offsets = [0, 0, 32], sizes = [2, 8, 32], strides = [1, 1, 1]} : vector<2x8x64xf32> to vector<2x8x32xf32>
    "tpu.trace_start"() <{level = 10 : i32, message = "bqd,bkd->bqk"}> : () -> ()
    %cst_8 = arith.constant dense<0.000000e+00> : vector<2x8x8xf32>
    %9 = tpu.matmul %2, %3, %cst_8 {dimension_numbers = #tpu.dot_dimension_numbers<[2], [2], [1], [1], [0, 0, 0, 1, 1, 1], [0], [0]>} : vector<2x8x64xf32>, vector<2x8x64xf32>, vector<2x8x8xf32> -> vector<2x8x8xf32>
    %cst_9 = arith.constant dense<0.000000e+00> : vector<2x8x8xf32>
    %10 = tpu.matmul %5, %8, %cst_9 {dimension_numbers = #tpu.dot_dimension_numbers<[2], [2], [1], [1], [0, 0, 0, 1, 1, 1], [0], [0]>} : vector<2x8x32xf32>, vector<2x8x32xf32>, vector<2x8x8xf32> -> vector<2x8x8xf32>
    %cst_10 = arith.constant dense<0.000000e+00> : vector<2x8x8xf32>
    %11 = tpu.matmul %6, %7, %cst_10 {dimension_numbers = #tpu.dot_dimension_numbers<[2], [2], [1], [1], [0, 0, 0, 1, 1, 1], [0], [0]>} : vector<2x8x32xf32>, vector<2x8x32xf32>, vector<2x8x8xf32> -> vector<2x8x8xf32>
    "tpu.trace_stop"() : () -> ()
    %12 = arith.subf %10, %11 : vector<2x8x8xf32>
    %13 = arith.mulf %9, %9 : vector<2x8x8xf32>
    %14 = arith.mulf %12, %12 : vector<2x8x8xf32>
    %15 = arith.addf %13, %14 : vector<2x8x8xf32>
    %16 = math.sqrt %15 : vector<2x8x8xf32>
    %cst_11 = arith.constant dense<0xFF800000> : vector<2x8xf32>
    %17 = vector.multi_reduction <maximumf>, %16, %cst_11 [2] : vector<2x8x8xf32> to vector<2x8xf32>
    %18 = vector.shape_cast %17 : vector<2x8xf32> to vector<2x8x1xf32>
    %19 = vector.broadcast %18 : vector<2x8x1xf32> to vector<2x8x8xf32>
    %20 = arith.subf %16, %19 : vector<2x8x8xf32>
    %21 = math.exp %20 : vector<2x8x8xf32>
    %cst_12 = arith.constant dense<0.000000e+00> : vector<2x8xf32>
    %22 = vector.multi_reduction <add>, %21, %cst_12 [2] : vector<2x8x8xf32> to vector<2x8xf32>
    %23 = vector.shape_cast %22 : vector<2x8xf32> to vector<2x8x1xf32>
    %24 = tpu.reciprocal %23 : vector<2x8x1xf32> -> vector<2x8x1xf32>
    %25 = vector.broadcast %24 : vector<2x8x1xf32> to vector<2x8x8xf32>
    %26 = arith.mulf %21, %25 : vector<2x8x8xf32>
    "tpu.trace_start"() <{level = 10 : i32, message = "bqk,bkd->bqd"}> : () -> ()
    %cst_13 = arith.constant dense<0.000000e+00> : vector<2x8x64xf32>
    %27 = tpu.matmul %26, %4, %cst_13 {dimension_numbers = #tpu.dot_dimension_numbers<[2], [1], [1], [2], [0, 0, 0, 1, 1, 2], [0], [0]>} : vector<2x8x8xf32>, vector<2x8x64xf32>, vector<2x8x64xf32> -> vector<2x8x64xf32>
    "tpu.trace_stop"() : () -> ()
    %c0_14 = arith.constant 0 : index
    %c0_15 = arith.constant 0 : index
    %c0_16 = arith.constant 0 : index
    %28 = vector.load %arg4[%c0_14, %c0_15, %c0_16] : memref<2x8x64xf32, #tpu.memory_space<vmem>>, vector<2x8x64xf32>
    tpu.vector_store %arg4[%c0_14, %c0_15, %c0_16], %27 {strides = array<i32>} : memref<2x8x64xf32, #tpu.memory_space<vmem>>, vector<2x8x64xf32>,
    %c0_17 = arith.constant 0 : index
    %c0_18 = arith.constant 0 : index
    %c0_19 = arith.constant 0 : index
    %29 = vector.load %arg5[%c0_17, %c0_18, %c0_19] : memref<2x8x8xf32, #tpu.memory_space<vmem>>, vector<2x8x8xf32>
    tpu.vector_store %arg5[%c0_17, %c0_18, %c0_19], %26 {strides = array<i32>} : memref<2x8x8xf32, #tpu.memory_space<vmem>>, vector<2x8x8xf32>,
    return
  }
  func.func @transform_0(%arg0: i32) -> (i32, i32, i32) {
    %c0_i32 = arith.constant 0 : i32
    %c0_i32_0 = arith.constant 0 : i32
    %c0_i32_1 = arith.constant 0 : i32
    return %arg0, %c0_i32, %c0_i32_0 : i32, i32, i32
  }
  func.func @transform_1(%arg0: i32) -> (i32, i32, i32) {
    %c0_i32 = arith.constant 0 : i32
    %c0_i32_0 = arith.constant 0 : i32
    %c0_i32_1 = arith.constant 0 : i32
    return %arg0, %c0_i32, %c0_i32_0 : i32, i32, i32
  }
  func.func @transform_2(%arg0: i32) -> (i32, i32, i32) {
    %c0_i32 = arith.constant 0 : i32
    %c0_i32_0 = arith.constant 0 : i32
    %c0_i32_1 = arith.constant 0 : i32
    return %arg0, %c0_i32, %c0_i32_0 : i32, i32, i32
  }
  func.func @transform_3(%arg0: i32) -> (i32, i32, i32) {
    %c0_i32 = arith.constant 0 : i32
    %c0_i32_0 = arith.constant 0 : i32
    %c0_i32_1 = arith.constant 0 : i32
    return %arg0, %c0_i32, %c0_i32_0 : i32, i32, i32
  }
  func.func @transform_4(%arg0: i32) -> (i32, i32, i32) {
    %c0_i32 = arith.constant 0 : i32
    %c0_i32_0 = arith.constant 0 : i32
    %c0_i32_1 = arith.constant 0 : i32
    return %arg0, %c0_i32, %c0_i32_0 : i32, i32, i32
  }
}

</mosaic_0001>

<bundles_post_ra>
// kernel: tpu_custom_call.1
= control target key start
LH: loop header
LB: loop body
LE: loop exit
PB: predicated region body
PF: predicated region fallthrough
CT: control target
= control target key end

     0   :  { %s1898_s0 = inlined_call_operand.hbm [shape: f32[4,8,64], index: 0, kind: input, shape index: {}]   ;;  %s1899_s1 = inlined_call_operand.hbm [shape: f32[4,8,64], index: 1, kind: input, shape index: {}]   ;;  %s1900_s2 = inlined_call_operand.hbm [shape: f32[4,8,64], index: 2, kind: input, shape index: {}]   ;;  %s1901_s3 = inlined_call_operand.hbm [shape: f32[4,8,64], index: 3, kind: output, shape index: {0}]   ;;  %s1902_s4 = inlined_call_operand.hbm [shape: f32[4,8,8], index: 4, kind: output, shape index: {1}]  }
   0x1   :  { %1909 = sst [smem:[#allocation15_spill]] %s1898_s0 }
   0x2   :  { %1910 = sst [smem:[#allocation16_spill]] %s1899_s1 }
   0x3   :  { %10 = vsyncpa [#allocation3], 0 }
   0x4   :  { %12 = vsyncpa [#allocation3 + $0x1], 0 }
   0x5   :  { %13 = vsyncpa [#allocation6], 0 }
   0x6   :  { %15 = vsyncpa [#allocation6 + $0x1], 0 }
   0x7   :  { %16 = vsyncpa [#allocation4], 0 }
   0x8   :  { %18 = vsyncpa [#allocation4 + $0x1], 0 }
   0x9   :  { %19 = vsyncpa [#allocation10], 0 }
   0xa   :  { %21 = vsyncpa [#allocation10 + $0x1], 0  ;;  %s1565_s15 = smov 0   ;;  %s1567_s16 = smov 0  }
   0xb   :  { %s1569_s17 = smov 0   ;;  %s1571_s18 = smov 0  }
   0xc LB: > { %s1586_s19 = sadd.s32 4294967295, %s1526_s18   ;;  %s1153_s20 = sadd.s32 4294967294, %s1526_s18   ;;  %s1526_s18 = sphi %s1571_s18, %s1930_s18   ;;  %s1522_s17 = sphi %s1569_s17, %s1929_s17   ;;  %s1518_s16 = sphi %s1567_s16, %s1928_s16   ;;  %s1514_s15 = sphi %s1565_s15, %s1927_s15  }
   0xd   : > { %s1590_s21 = sadd.s32 1, %s1526_s18   ;;  %s34_s22 = sadd.s32 1, %s1522_s17 }
   0xe   : > { %s31_s23 = ssub.s32 %s1526_s18, %s1590_s21  ;;  %p41_p0 = scmp.ne.s32.totalorder %s1522_s17, %s1518_s16 }
   0xf   : > { %p32_p1 = scmp.eq.s32.totalorder %s31_s23, 0  ;;  %p42_p2 = scmp.eq.s32.totalorder %s1526_s18, 0 }
  0x10   : > { %p47_p3 = scmp.ne.s32.totalorder %s1518_s16, %s1514_s15  ;;  %p48_p4 = scmp.eq.s32.totalorder %s1586_s19, 0 }
  0x11   : > { %s1602_s24 = scalar_select %p32_p1, %s1522_s17, %s34_s22  }
  0x12   : > { %p43_p5 = por %p42_p2, %p41_p0  ;;  %p1604_p6 = por %p48_p4, %p47_p3 }
  0x13   : > { %p123_p7 = scmp.eq.s32.totalorder %s1586_s19, 1  ;;  %p129_p8 = scmp.eq.s32.totalorder %s1153_s20, 1 }
  0x14   : > { %s1911_s25 = scalar_select %p1604_p6, 1, 0 }
  0x15   : > { %p1281_p10 = scmp.lt.s32.totalorder %s1526_s18, 2  ;;  %p1611_p11 = por %p123_p7, %p41_p0 }
  0x16   : > { %p1615_p12 = por %p129_p8, %p47_p3  ;;  %s175_s28 = sand.u32 1, %s1522_s17  }
  0x17   : > { %s1912_s26 = scalar_select %p1611_p11, 1, 0 }
  0x18   : > { %s1913_s27 = scalar_select %p1615_p12, 1, 0 }
  0x19   : > { %s1621_s29 = sshll.u32 %s1526_s18, 8  ;;  %s1625_s30 = sshll.u32 %s175_s28, 4 }
  0x1a   : > { %p1627_p13 = pnand %p1281_p10, %p43_p5  ;;  %s196_s6 = sand.u32 1, %s1526_s18  }
  0x1b   : > { %s1915_s1 = sld [smem:[#allocation16_spill]]  ;;  %s200_s10 = scalar_lea.vmem [#allocation5], %s1625_s30 }
  0x1c   : > { %s207_s11 = sshll.u32 %s200_s10, 4  ;;  %s1642_s12 = scalar_lea.sflag [#allocation6], %s196_s6  ;;  %s1639_s11 = int_to_ptr.vmem [resolvable:$true] %s207_s11 }
  0x1d   : > { %p1648_p2 = pneg %p1627_p13 }
  0x21   : > { %s1636_s9 = scalar_lea.hbm %s1915_s1, %s1621_s29  ;;  %s1339_s23 = scalar_lea.hbm %s1915_s1, 512 }
  0x22   : > { %s1334_s13 = scalar_lea.hbm %s1636_s9, 256  ;;  %p1340_p5 = scmp.lt.u32.totalorder %s1636_s9, %s1915_s1 }
  0x23   : > { %p1335_p1 = scmp.ne.s32.totalorder %s1636_s9, %s1334_s13  ;;  %p1341_p7 = scmp.lt.u32.totalorder %s1339_s23, %s1334_s13 }
  0x24   : > { %p1343_p10 = scmp.lt.u32.totalorder %s1334_s13, %s1636_s9 }
  0x25   : > { %p1337_p3 = pnand %p1648_p2, %p1335_p1  ;;  %p1342_p8 = por %p1341_p7, %p1340_p5 }
  0x27   : > { %p1338_p4 = pneg %p1337_p3  ;;  %p1344_p9 = por %p1343_p10, %p1342_p8 }
  0x29   : > { %p1345_p0 = pnand %p1344_p9, %p1338_p4 }
  0x2b   : > { %1348 = shalt.err (!%p1345_p0)
}
  0x2c   : > { %s1349_s6 = scalar_lea.vmem %s1639_s11, 256  ;;  %s1528_s10 = smov [#allocation5]  }
  0x2d   : > { %p1350_p1 = scmp.ne.s32.totalorder %s1639_s11, %s1349_s6  ;;  %s1354_s20 = sshll.u32 %s1528_s10, 4  ;;  %s1355_s20 = int_to_ptr.vmem [resolvable:$false] %s1354_s20 }
  0x2e   : > { %s1356_s22 = scalar_lea.vmem %s1355_s20, 512  ;;  %p1357_p11 = scmp.lt.s32.totalorder %s1639_s11, %s1355_s20 }
  0x2f   : > { %p1352_p3 = pnand %p1350_p1, %p1648_p2  ;;  %p1358_p6 = scmp.lt.s32.totalorder %s1356_s22, %s1349_s6 }
  0x31   : > { %p1353_p12 = pneg %p1352_p3  ;;  %p1359_p5 = por %p1358_p6, %p1357_p11 }
  0x33   : > { %p1360_p7 = pnand %p1359_p5, %p1353_p12 }
  0x35   : > { %1363 = shalt.err (!%p1360_p7)
}
  0x36   : > { %s1905_s13 = smov 128   ;;  %s1907_s23 = smov 8  }
  0x37   : > { %1270 = dma.hbm_to_vmem [thread:$0]  (!%p1627_p13), %s1636_s9, 256, %s1639_s11, %s1642_s12, %s1905_s13, %s1905_s13, %s1907_s23  }
  0x38   : > { %p236_p6 = scmp.lt.s32.totalorder %s1526_s18, 3  ;;  %s1917_s0 = sld [smem:[#allocation15_spill]] }
  0x39   : > { %p1918_p9 = scmp.ge.s32.totalorder %s1526_s18, 1  ;;  %s179_s20 = scalar_lea.vmem [#allocation2], %s1625_s30 }
  0x3a   : > { %s186_s22 = sshll.u32 %s179_s20, 4  ;;  %s1693_s9 = scalar_lea.sflag [#allocation3], %s175_s28  ;;  %s1689_s22 = int_to_ptr.vmem [resolvable:$true] %s186_s22 }
  0x3b   : > { %p1684_p11 = pnand %p1918_p9, %p236_p6 }
  0x3d   : > { %s1919_s10 = scalar_select %p1684_p11, 1, 0 }
  0x3e   : > { %s1680_s6 = scalar_lea.hbm %s1917_s0, %s1621_s29  ;;  %s1369_s13 = scalar_lea.hbm %s1917_s0, 512 }
  0x3f   : > { %s1364_s11 = scalar_lea.hbm %s1680_s6, 256  ;;  %p1370_p8 = scmp.lt.u32.totalorder %s1680_s6, %s1917_s0 }
  0x40   : > { %p1365_p12 = scmp.ne.s32.totalorder %s1680_s6, %s1364_s11  ;;  %p1371_p10 = scmp.lt.u32.totalorder %s1369_s13, %s1364_s11 }
  0x41   : > { %p1373_p3 = scmp.lt.u32.totalorder %s1364_s11, %s1680_s6 }
  0x42   : > { %p1367_p0 = pnand %p1365_p12, %p1648_p2  ;;  %p1372_p1 = por %p1371_p10, %p1370_p8 }
  0x44   : > { %p1368_p4 = pneg %p1367_p0  ;;  %p1374_p5 = por %p1373_p3, %p1372_p1 }
  0x46   : > { %p1375_p7 = pnand %p1374_p5, %p1368_p4 }
  0x48   : > { %1378 = shalt.err (!%p1375_p7)
}
  0x49   : > { %s1379_s28 = scalar_lea.vmem %s1689_s22, 256  ;;  %s1531_s20 = smov [#allocation2]  }
  0x4a   : > { %p1380_p6 = scmp.ne.s32.totalorder %s1689_s22, %s1379_s28  ;;  %s1384_s7 = sshll.u32 %s1531_s20, 4  ;;  %s1385_s7 = int_to_ptr.vmem [resolvable:$false] %s1384_s7 }
  0x4b   : > { %s1386_s1 = scalar_lea.vmem %s1385_s7, 512  ;;  %p1387_p0 = scmp.lt.s32.totalorder %s1689_s22, %s1385_s7 }
  0x4c   : > { %p1382_p9 = pnand %p1380_p6, %p1648_p2  ;;  %p1388_p11 = scmp.lt.s32.totalorder %s1386_s1, %s1379_s28 }
  0x4e   : > { %p1383_p12 = pneg %p1382_p9  ;;  %p1389_p8 = por %p1388_p11, %p1387_p0 }
  0x50   : > { %p1390_p10 = pnand %p1389_p8, %p1383_p12 }
  0x52   : > { %1393 = shalt.err (!%p1390_p10)
}
  0x53   : > { %s1920_s13 = smov 8   ;;  %s1921_s23 = smov 128  }
  0x54   : > { %1267 = dma.hbm_to_vmem [thread:$0]  (!%p1627_p13), %s1680_s6, 256, %s1689_s22, %s1693_s9, %s1921_s23, %s1921_s23, %s1920_s13  }
  0x55   : > { %s1724_s20 = scalar_lea.hbm %s1900_s2, %s1621_s29  ;;  %s221_s28 = scalar_lea.vmem [#allocation7], %s1625_s30 }
  0x56   : > { %s228_s7 = sshll.u32 %s221_s28, 4  ;;  %s1394_s1 = scalar_lea.hbm %s1724_s20, 256  ;;  %s1727_s7 = int_to_ptr.vmem [resolvable:$true] %s228_s7 }
  0x57   : > { %p1395_p11 = scmp.ne.s32.totalorder %s1724_s20, %s1394_s1  ;;  %s1399_s22 = scalar_lea.hbm %s1900_s2, 512 }
  0x58   : > { %p1400_p3 = scmp.lt.u32.totalorder %s1724_s20, %s1900_s2  ;;  %p1401_p5 = scmp.lt.u32.totalorder %s1399_s22, %s1394_s1 }
  0x59   : > { %p1397_p4 = pnand %p1395_p11, %p1648_p2  ;;  %p1403_p6 = scmp.lt.u32.totalorder %s1394_s1, %s1724_s20 }
  0x5a   : > { %p1402_p7 = por %p1401_p5, %p1400_p3 }
  0x5b   : > { %p1398_p1 = pneg %p1397_p4 }
  0x5c   : > { %p1404_p9 = por %p1403_p6, %p1402_p7 }
  0x5e   : > { %p1405_p12 = pnand %p1404_p9, %p1398_p1 }
  0x60   : > { %1408 = shalt.err (!%p1405_p12)
}
  0x61   : > { %s1409_s30 = scalar_lea.vmem %s1727_s7, 256  ;;  %s1532_s0 = smov [#allocation7]  }
  0x62   : > { %p1410_p0 = scmp.ne.s32.totalorder %s1727_s7, %s1409_s30  ;;  %s1414_s11 = sshll.u32 %s1532_s0, 4  ;;  %s1415_s11 = int_to_ptr.vmem [resolvable:$false] %s1414_s11 }
  0x63   : > { %s1416_s8 = scalar_lea.vmem %s1415_s11, 512  ;;  %p1417_p11 = scmp.lt.s32.totalorder %s1727_s7, %s1415_s11 }
  0x64   : > { %p1412_p8 = pnand %p1410_p0, %p1648_p2  ;;  %p1418_p4 = scmp.lt.s32.totalorder %s1416_s8, %s1409_s30 }
  0x66   : > { %p1413_p10 = pneg %p1412_p8  ;;  %p1419_p3 = por %p1418_p4, %p1417_p11 }
  0x68   : > { %p1420_p5 = pnand %p1419_p3, %p1413_p10 }
  0x6a   : > { %1423 = shalt.err (!%p1420_p5)
}
  0x6b   : > { %1273 = dma.hbm_to_vmem [thread:$0]  (!%p1627_p13), %s1724_s20, 256, %s1727_s7, %s1642_s12, %s1921_s23, %s1921_s23, %s1920_s13  }
  0x6c   : > { %p1922_p2 = scmp.ne.s32.totalorder %s1919_s10, 0 }
  0x6d   : > { %s1757_s14 = sand.u32 (!%p1922_p2), 1, %s1518_s16   ;;  %p1923_p1 = scmp.ne.s32.totalorder (!%p1922_p2), %s1911_s25, 0 }
  0x6e   : > { %240 = sbr.rel (%p1922_p2) target bundleno = 1023 (0x3ff), region = 32  ;;  %s1760_s28 = sshll.u32 (!%p1922_p2), %s1757_s14, 4 }
  0x6f   : > { %s243_s5 = scalar_lea.sflag (!%p1922_p2), [#allocation3], %s1757_s14  ;;  %s246_s1 = scalar_lea.vmem (!%p1922_p2), [#allocation2], %s1760_s28 }
  0x75   : > { %1497 = dma.done.wait (%p1923_p1), %s243_s5, 256  }
  0x76   : > { %1499 = vsyncadd (%p1923_p1), %s243_s5, 4294967040  ;;  %s251_s12 = sand.u32 1, %s1586_s19   ;;  %s255_s13 = scalar_lea.vmem [#allocation5], %s1760_s28 }
  0x77   : > { %s252_s10 = scalar_lea.sflag [#allocation6], %s251_s12 }
  0x78   : > { %1501 = dma.done.wait (%p1923_p1), %s252_s10, 512  }
  0x79   : > { %1503 = vsyncadd (%p1923_p1), %s252_s10, 4294966784  ;;  %v1533_v0 = vmov 0.0   ;;  %vm1534_vm0 = vmmov 0   ;;  %vm317_vm1 = vcmask 523264   ;;  %v313_v1 = vld [vmem:[%s255_s13] sm:$0xff]  ;;  %s1535_s23 = smov 96  }
  0x7a   : > { %1214 = vmatprep.subr.mxu0 %v1533_v0  ;;  %1216 = vmatprep.mubr.msk.f32.mxu0 %vm1534_vm0, %v1533_v0  ;;  %v309_v2 = vld [vmem:[%s246_s1] sm:$0xff]  ;;  %v314_v3 = vld [vmem:[%s255_s13 + $0x8] sm:$0xff]  ;;  %vm472_vm2 = vcmask 261120   ;;  %vm797_vm4 = vcmask 64512   ;;  %s264_s25 = scalar_lea.vmem [#allocation7], %s1760_s28  ;;  %s303_s20 = scalar_lea.vmem [#allocation9], %s1760_s28 }
  0x7b   : > { %1219 = vmatprep.subr.mxu1 %v1533_v0  ;;  %1221 = vmatprep.mubr.msk.f32.mxu1 %vm1534_vm0, %v1533_v0  ;;  %v311_v4 = vmul.f32 0.17677669, %v309_v2  ;;  %v310_v5 = vld [vmem:[%s246_s1 + $0x8] sm:$0xff]  ;;  %v315_v53 = vld [vmem:[%s264_s25] sm:$0xff]  ;;  %s1196_s7 = sshll.u32 %s1586_s19, 8  ;;  %s1005_s29 = sshll.u32 %s303_s20, 4  ;;  %s1812_s29 = int_to_ptr.vmem [resolvable:$true] %s1005_s29 }
  0x7c   : > { %470 = vrot.lane.b32.xlu0 %v313_v1, %s1535_s23  ;;  %1215 = vmatpush3.xpose.msk.msra.mxu0 %vm317_vm1, %v313_v1  ;;  %v312_v6 = vmul.f32 0.17677669, %v310_v5  ;;  %v316_v54 = vld [vmem:[%s264_s25 + $0x8] sm:$0xff]  ;;  %s1810_s9 = scalar_lea.hbm %s1902_s4, %s1196_s7  ;;  %s976_s30 = scalar_lea.sflag [#allocation10], %s1757_s14 }
  0x7d   : > { %1224 = vmatprep.subr.mxu0 %v1533_v0  ;;  %1220 = vmatpush3.xpose.msk.msra.mxu1 %vm317_vm1, %v314_v3  ;;  %s1424_s0 = scalar_lea.vmem %s1812_s29, 256  ;;  %p1924_p7 = scmp.ne.s32.totalorder %s1912_s26, 0 }
  0x7e   : > { %623 = vrot.lane.b32.xlu1 %v311_v4, %s1535_s23  ;;  %1229 = vmatprep.subr.mxu1 %v1533_v0  ;;  %p1425_p13 = scmp.ne.s32.totalorder %s1812_s29, %s1424_s0  ;;  %s1536_s11 = smov [#allocation9]  }
  0x7f   : > { %1217 = vmatmul.mubr.msk.f32.vlgmr.msra.gmra.mrb[0].mxu0 %vm317_vm1, %v311_v4  ;;  %s1428_s8 = sshll.u32 %s1536_s11, 4  ;;  %s1429_s8 = int_to_ptr.vmem [resolvable:$false] %s1428_s8 }
  0x80   : > { %547 = vrot.lane.b32.xlu0 %v314_v3, %s1535_s23  ;;  %1226 = vmatprep.mubr.msk.f32.mxu0 %vm1534_vm0, %v1533_v0  ;;  %p1426_p6 = pnand %p1425_p13, %p1924_p7  ;;  %s1430_s5 = scalar_lea.vmem %s1429_s8, 512 }
  0x81   : > { %1222 = vmatmul.mubr.msk.f32.vlgmr.msra.gmra.mrb[0].mxu1 %vm317_vm1, %v312_v6  ;;  %p1431_p12 = scmp.lt.s32.totalorder %s1812_s29, %s1429_s8  ;;  %p1432_p0 = scmp.lt.s32.totalorder %s1430_s5, %s1424_s0 }
  0x82   : > { %699 = vrot.lane.b32.xlu1 %v312_v6, %s1535_s23  ;;  %1231 = vmatprep.mubr.msk.f32.mxu1 %vm1534_vm0, %v1533_v0  ;;  %p1427_p9 = pneg %p1426_p6 }
  0x83   : > { %p1433_p8 = por %p1432_p0, %p1431_p12 }
  0x85   : > { %p1434_p10 = pnand %p1433_p8, %p1427_p9 }
  0xee   : > { %v471_v7 = vpop.permute.xlu0 %470 }
  0xef   : > { %1225 = vmatpush3.xpose.msk.msra.mxu0 %vm472_vm2, %v471_v7 }
  0xf0   : > { %1234 = vmatprep.subr.mxu0 %v1533_v0  ;;  %v624_v8 = vpop.permute.xlu1 %623 }
  0xf2   : > { %v548_v9 = vpop.permute.xlu0 %547  ;;  %1227 = vmatmul.mubr.msk.f32.vlgmr.msra.gmra.mrb[2].mxu0 %vm472_vm2, %v311_v4 }
  0xf3   : > { %1230 = vmatpush3.xpose.msk.msra.mxu1 %vm472_vm2, %v548_v9  ;;  %1235 = vmatpush3.xpose.msk.msra.mxu0 %vm472_vm2, %v313_v1 }
  0xf4   : > { %1236 = vmatprep.mubr.msk.f32.mxu0 %vm1534_vm0, %v1533_v0  ;;  %1239 = vmatprep.subr.mxu1 %v1533_v0  ;;  %v700_v10 = vpop.permute.xlu1 %699 }
  0xf5   : > { %1244 = vmatprep.subr.mxu0 %v1533_v0 }
  0xf6   : > { %1232 = vmatmul.mubr.msk.f32.vlgmr.msra.gmra.mrb[2].mxu1 %vm472_vm2, %v312_v6  ;;  %1237 = vmatmul.mubr.msk.f32.vlgmr.msra.gmra.mrb[4].mxu0 %vm472_vm2, %v624_v8 }
  0xf7   : > { %1240 = vmatpush3.xpose.msk.msra.mxu1 %vm472_vm2, %v314_v3  ;;  %1241 = vmatprep.mubr.msk.f32.mxu1 %vm1534_vm0, %v1533_v0 }
  0xf8   : > { %1246 = vmatprep.mubr.msk.f32.mxu0 %vm1534_vm0, %v1533_v0  ;;  %1249 = vmatprep.subr.mxu1 %v1533_v0 }
  0xf9   : > { %1245 = vmatpush3.msra.mxu0 %v315_v53 }
  0xfa   : > { %1242 = vmatmul.mubr.msk.f32.vlgmr.msra.gmra.mrb[4].mxu1 %vm472_vm2, %v700_v10 }
  0xfb   : > { %1251 = vmatprep.mubr.msk.f32.mxu1 %vm1534_vm0, %v1533_v0  ;;  %1250 = vmatpush3.msra.mxu1 %v316_v54 }
 0x152   : > { %v390_v11 = vpop.f32.mrb[0].mxu0 }
 0x153   : > { %v1218_v12 = vpop.f32.mrb[1].mxu0  ;;  %v777_v22 = vmul.f32 %v390_v11, %v390_v11 }
 0x154   : > { %v466_v13 = vpop.f32.mrb[0].mxu1 }
 0x155   : > { %v1223_v14 = vpop.f32.mrb[1].mxu1  ;;  %v778_v28 = vmul.f32 %v466_v13, %v466_v13 }
 0x1c5   : > { %v543_v15 = vpop.f32.mrb[2].mxu0 }
 0x1c6   : > { %v1228_v16 = vpop.f32.mrb[3].mxu0 }
 0x1c9   : > { %v619_v17 = vpop.f32.mrb[2].mxu1  ;;  %v695_v18 = vpop.f32.mrb[4].mxu0 }
 0x1ca   : > { %v775_v19 = vsub.f32 %v543_v15, %v695_v18  ;;  %v1233_v20 = vpop.f32.mrb[3].mxu1  ;;  %v1238_v21 = vpop.f32.mrb[5].mxu0 }
 0x1cc   : > { %v779_v23 = vmul.f32 %v775_v19, %v775_v19 }
 0x1cd   : > { %v771_v24 = vpop.f32.mrb[4].mxu1 }
 0x1ce   : > { %v781_v25 = vadd.f32 %v779_v23, %v777_v22  ;;  %v776_v26 = vsub.f32 %v619_v17, %v771_v24  ;;  %v1243_v27 = vpop.f32.mrb[5].mxu1 }
 0x1d0   : > { %v780_v29 = vmul.f32 %v776_v26, %v776_v26  ;;  %1322 = vrsqrt.f32 %v781_v25  ;;  %vm785_vm3 = vcmp.eq.f32.partialorder %v781_v25, inf  ;;  %v788_v33 = vand.u32 2147483648, %v781_v25 }
 0x1d1   : > { %vm787_vm5 = vcmp.eq.f32.partialorder %v781_v25, 0.0 }
 0x1d2   : > { %v782_v30 = vadd.f32 %v780_v29, %v778_v28 }
 0x1d4   : > { %1324 = vrsqrt.f32 %v782_v30  ;;  %vm792_vm6 = vcmp.eq.f32.partialorder %v782_v30, inf  ;;  %v795_v39 = vand.u32 2147483648, %v782_v30  ;;  %vm794_vm7 = vcmp.eq.f32.partialorder %v782_v30, 0.0 }
 0x1da   : > { %v1323_v31 = vpop.eup %1322 }
 0x1db   : > { %v784_v32 = vmul.f32 %v1323_v31, %v781_v25 }
 0x1dd   : > { %v786_v34 = vsel %vm785_vm3, %v781_v25, %v784_v32 }
 0x1de   : > { %v1325_v35 = vpop.eup %1324  ;;  %v789_v36 = vsel %vm787_vm5, %v788_v33, %v786_v34 }
 0x1df   : > { %v798_v37 = vsel %vm797_vm4, %v789_v36, -inf  ;;  %v791_v38 = vmul.f32 %v1325_v35, %v782_v30 }
 0x1e0   : > { %799 = vmax.xlane.f32.xlu0 %v798_v37 }
 0x1e1   : > { %v793_v40 = vsel %vm792_vm6, %v782_v30, %v791_v38 }
 0x1e2   : > { %v796_v41 = vsel %vm794_vm7, %v795_v39, %v793_v40 }
 0x1e3   : > { %v801_v42 = vsel %vm797_vm4, %v796_v41, -inf }
 0x1e4   : > { %802 = vmax.xlane.f32.xlu1 %v801_v42 }
 0x26d   : > { %v800_v43 = vpop.xlane.xlu0 %799 }
 0x26e   : > { %v804_v44 = vsub.f32 %v789_v36, %v800_v43 }
 0x270   : > { %v806_v45 = vmul.f32 1.442695, %v804_v44 }
 0x271   : > { %v803_v46 = vpop.xlane.xlu1 %802 }
 0x272   : > { %1326 = vpow2.f32 %v806_v45  ;;  %v805_v47 = vsub.f32 %v796_v41, %v803_v46 }
 0x274   : > { %v808_v48 = vmul.f32 1.442695, %v805_v47 }
 0x276   : > { %1328 = vpow2.f32 %v808_v48 }
 0x27c   : > { %v1327_v49 = vpop.eup %1326 }
 0x27d   : > { %v810_v50 = vsel %vm797_vm4, %v1327_v49, 0.0 }
 0x27e   : > { %811 = vadd.xlane.f32.xlu0 %v810_v50 }
 0x280   : > { %v1329_v51 = vpop.eup %1328 }
 0x281   : > { %v813_v52 = vsel %vm797_vm4, %v1329_v51, 0.0 }
 0x282   : > { %814 = vadd.xlane.f32.xlu0 %v813_v52 }
 0x30b   : > { %v812_v55 = vpop.xlane.xlu0 %811 }
 0x30c   : > { %1330 = vrcp.f32 %v812_v55 }
 0x30f   : > { %v815_v56 = vpop.xlane.xlu0 %814 }
 0x310   : > { %1332 = vrcp.f32 %v815_v56 }
 0x316   : > { %v1331_v57 = vpop.eup %1330 }
 0x317   : > { %v818_v58 = vmul.f32 %v1331_v57, %v1327_v49 }
 0x319   : > { %1247 = vmatmul.mubr.msk.f32.vlgmr.msra.gmra.mrb[6].mxu0 %vm797_vm4, %v818_v58  ;;  %968 = vst.msk [vmem:[%s303_s20] sm:$0xff] %vm797_vm4, %v818_v58 }
 0x31a   : > { %v1333_v59 = vpop.eup %1332 }
 0x31b   : > { %v819_v60 = vmul.f32 %v1333_v59, %v1329_v51 }
 0x31d   : > { %1252 = vmatmul.mubr.msk.f32.vlgmr.msra.gmra.mrb[6].mxu1 %vm797_vm4, %v819_v60  ;;  %969 = vst.msk [vmem:[%s303_s20 + $0x8] sm:$0xff] %vm797_vm4, %v819_v60 }
 0x31e   : > { %1437 = shalt.err (!%p1434_p10)
}
 0x31f   : > { %s1438_s1 = scalar_lea.hbm %s1810_s9, 256  ;;  %s1442_s13 = scalar_lea.hbm %s1902_s4, 512 }
 0x320   : > { %p1439_p11 = scmp.ne.s32.totalorder %s1810_s9, %s1438_s1  ;;  %p1443_p5 = scmp.lt.u32.totalorder %s1810_s9, %s1902_s4 }
 0x321   : > { %p1444_p2 = scmp.lt.u32.totalorder %s1442_s13, %s1438_s1  ;;  %p1446_p13 = scmp.lt.u32.totalorder %s1438_s1, %s1810_s9 }
 0x322   : > { %p1440_p4 = pnand %p1439_p11, %p1924_p7 }
 0x323   : > { %p1445_p1 = por %p1444_p2, %p1443_p5 }
 0x324   : > { %p1441_p3 = pneg %p1440_p4 }
 0x325   : > { %p1447_p6 = por %p1446_p13, %p1445_p1 }
 0x327   : > { %p1448_p9 = pnand %p1447_p6, %p1441_p3 }
 0x329   : > { %1451 = shalt.err (!%p1448_p9)
}
 0x32a   : > { %s1537_s20 = smov 128   ;;  %s1538_s6 = smov 8  }
 0x32b   : > { %1261 = dma.vmem_to_hbm [thread:$0]  (%p1924_p7), %s1812_s29, 256, %s1810_s9, %s976_s30, %s1537_s20, %s1537_s20, %s1538_s6  }
 0x32c   : > { %s296_s22 = scalar_lea.vmem [#allocation8], %s1760_s28  ;;  %s1850_s5 = scalar_lea.hbm %s1901_s3, %s1196_s7 }
 0x32d   : > { %s989_s0 = sshll.u32 %s296_s22, 4  ;;  %s971_s28 = scalar_lea.sflag [#allocation4], %s1757_s14  ;;  %s1843_s0 = int_to_ptr.vmem [resolvable:$true] %s989_s0 }
 0x32e   : > { %s1452_s9 = scalar_lea.vmem %s1843_s0, 256  ;;  %s1539_s29 = smov [#allocation8]  }
 0x32f   : > { %p1453_p12 = scmp.ne.s32.totalorder %s1843_s0, %s1452_s9  ;;  %s1456_s19 = sshll.u32 %s1539_s29, 4  ;;  %s1457_s19 = int_to_ptr.vmem [resolvable:$false] %s1456_s19 }
 0x330   : > { %s1458_s30 = scalar_lea.vmem %s1457_s19, 512  ;;  %p1459_p10 = scmp.lt.s32.totalorder %s1843_s0, %s1457_s19 }
 0x331   : > { %p1454_p0 = pnand %p1453_p12, %p1924_p7  ;;  %p1460_p11 = scmp.lt.s32.totalorder %s1458_s30, %s1452_s9 }
 0x333   : > { %p1455_p8 = pneg %p1454_p0  ;;  %p1461_p4 = por %p1460_p11, %p1459_p10 }
 0x335   : > { %p1462_p3 = pnand %p1461_p4, %p1455_p8 }
 0x3ec   : > { %v889_v61 = vpop.f32.mrb[6].mxu0 }
 0x3ed   : > { %966 = vst.msk [vmem:[%s296_s22] sm:$0xff] %vm317_vm1, %v889_v61  ;;  %v1248_v62 = vpop.f32.mrb[7].mxu0 }
 0x3f0   : > { %v962_v63 = vpop.f32.mrb[6].mxu1 }
 0x3f1   : > { %967 = vst.msk [vmem:[%s296_s22 + $0x8] sm:$0xff] %vm317_vm1, %v962_v63  ;;  %v1253_v0 = vpop.f32.mrb[7].mxu1 }
 0x3f2   : > { %1465 = shalt.err (!%p1462_p3)
}
 0x3f3   : > { %s1466_s7 = scalar_lea.hbm %s1850_s5, 256  ;;  %s1470_s10 = scalar_lea.hbm %s1901_s3, 512 }
 0x3f4   : > { %p1467_p5 = scmp.ne.s32.totalorder %s1850_s5, %s1466_s7  ;;  %p1471_p13 = scmp.lt.u32.totalorder %s1850_s5, %s1901_s3 }
 0x3f5   : > { %p1472_p6 = scmp.lt.u32.totalorder %s1470_s10, %s1466_s7  ;;  %p1474_p12 = scmp.lt.u32.totalorder %s1466_s7, %s1850_s5 }
 0x3f6   : > { %p1468_p2 = pnand %p1467_p5, %p1924_p7 }
 0x3f7   : > { %p1473_p9 = por %p1472_p6, %p1471_p13 }
 0x3f8   : > { %p1469_p1 = pneg %p1468_p2 }
 0x3f9   : > { %p1475_p0 = por %p1474_p12, %p1473_p9 }
 0x3fb   : > { %p1476_p8 = pnand %p1475_p0, %p1469_p1 }
 0x3fd   : > { %1479 = shalt.err (!%p1476_p8)
}
 0x3fe   : > { %1260 = dma.vmem_to_hbm [thread:$0]  (%p1924_p7), %s1843_s0, 256, %s1850_s5, %s971_s28, %s1537_s20, %s1537_s20, %s1538_s6  }
 0x3ff PF: > { %s1020_s25 = sand.u32 1, %s1514_s15   ;;  %p1925_p10 = scmp.ne.s32.totalorder %s1913_s27, 0 }
 0x400   : > { %p1926_p11 = scmp.ge.s32.totalorder %s1526_s18, 2  ;;  %s1021_s22 = scalar_lea.sflag [#allocation4], %s1020_s25 }
 0x402   : > { %p1275_p4 = pnand %p1926_p11, %p1925_p10 }
 0x404   : > { %1505 = dma.done.wait (!%p1275_p4), %s1021_s22, 256  }
 0x405   : > { %1507 = vsyncadd (!%p1275_p4), %s1021_s22, 4294967040  ;;  %s1030_s26 = scalar_lea.sflag [#allocation10], %s1020_s25 }
 0x406   : > { %1509 = dma.done.wait (!%p1275_p4), %s1030_s26, 256  }
 0x407   : > { %1511 = vsyncadd (!%p1275_p4), %s1030_s26, 4294967040  ;;  %p24_p7 = scmp.ge.s32.totalorder %s1590_s21, 4   ;;  %s1927_s15 = smov %s1518_s16 }
 0x408   : > { %s1928_s16 = smov %s1522_s17  ;;  %s1929_s17 = smov %s1602_s24 }
 0x409   : > { %s1930_s18 = smov %s1590_s21  ;;  %26 = sbr.rel (!%p24_p7) target bundleno = 12 (0xc), region = 118 }
 0x410   :  { %1035 = vsyncpa [#allocation3], 1 }
 0x411   :  { %1037 = vsyncpa [#allocation3 + $0x1], 1 }
 0x412   :  { %1038 = vsyncpa [#allocation6], 1 }
 0x413   :  { %1040 = vsyncpa [#allocation6 + $0x1], 1 }
 0x414   :  { %1041 = vsyncpa [#allocation4], 1 }
 0x415   :  { %1043 = vsyncpa [#allocation4 + $0x1], 1 }
 0x416   :  { %1044 = vsyncpa [#allocation10], 1 }
 0x417   :  { %1046 = vsyncpa [#allocation10 + $0x1], 1 }

</bundles_post_ra>
